<compile_context>
chip_gen: v7x
topology: tpu7x:2x2x1
jax: 0.10.0
libtpu: 0.0.40
codegen_flags: <defaults>
</compile_context>

<pallas_src>
import functools
import math

import jax
import jax.numpy as jnp
from jax.experimental import pallas as pl
from jax.experimental.pallas import tpu as pltpu


@functools.lru_cache(maxsize=None)
def _arcsin_supported() -> bool:
    """Probe (once) whether jnp.arcsin lowers through Pallas/Mosaic on this JAX."""
    def _k(x_ref, o_ref):
        o_ref[...] = jnp.arcsin(x_ref[...])
    try:
        fn = pl.pallas_call(
            _k, out_shape=jax.ShapeDtypeStruct((8, 128), jnp.float32))
        jax.block_until_ready(fn(jnp.zeros((8, 128), jnp.float32)))
        return True
    except Exception:
        return False


def _li_arcface_kernel(lbl_ref, f_ref, invf_ref, w_ref, invw_ref, o_ref, *,
                       m, s, use_arcsin):
    """lbl: (TB,1) i32, f: (TB,D), invf: (TB,1) f32, w: (TC,D), invw: (1,TC) f32,
    o: (TB,TC)."""
    tb, tc = o_ref.shape

    # Raw inner products on the MXU (bf16 operands, f32 accumulation); the L2
    # normalization (precomputed from the f32 tensors) is folded in afterwards.
    acc = jax.lax.dot_general(
        f_ref[...], w_ref[...],
        dimension_numbers=(((1,), (1,)), ((), ())),
        preferred_element_type=jnp.float32,
    )                                                        # (TB, TC) f32

    cos = jnp.clip(acc * invf_ref[...] * invw_ref[...], -1.0, 1.0)

    # theta = acos(cos); logits = s*(pi - 2*(theta + m*one_hot))/pi
    #                          = (2s/pi)*asin(cos) - (2sm/pi)*one_hot
    if use_arcsin:
        asin = jnp.arcsin(cos)
    else:
        # Verified-working fallback: asin(x) = atan2(x, sqrt(1 - x^2)).
        asin = jnp.arctan2(cos, jnp.sqrt(jnp.maximum(1.0 - cos * cos, 0.0)))

    # One-hot margin, with the tile's column offset folded into the label so we
    # only pay a (TB,1) scalar subtract instead of a (TB,TC) int32 add.
    local_lbl = lbl_ref[...] - pl.program_id(1) * tc         # (TB, 1) i32
    class_ids = jax.lax.broadcasted_iota(jnp.int32, (tb, tc), 1)

    out = jnp.float32(2.0 * s / math.pi) * asin
    out = jnp.where(class_ids == local_lbl,
                    out - jnp.float32(2.0 * s * m / math.pi), out)
    o_ref[...] = out.astype(o_ref.dtype)


def _auto_tile_b(batch, tile_c, d, mm_itemsize, budget_bytes):
    """Largest batch tile whose double-buffered footprint fits the VMEM budget."""
    per_row = 2 * tile_c * 4 + 2 * d * mm_itemsize + 16      # out rows + feature rows
    fixed = 2 * tile_c * (d * mm_itemsize + 4)               # weight + inv_w tiles (x2)
    avail = max(budget_bytes - fixed, 8 * per_row)
    return max(8, min(batch, int(avail // per_row)))


def li_arcface_head(features, weight, labels, *, m, s,
                    tile_b=None, tile_c=512,
                    compute_dtype=jnp.bfloat16, out_dtype=jnp.float32,
                    vmem_budget_bytes=12 * 1024 * 1024):
    """features: (B, D), weight: (C, D), labels: (B,) int -> logits (B, C)."""
    features = jnp.asarray(features, jnp.float32)
    weight = jnp.asarray(weight, jnp.float32)
    B, D = features.shape
    C, D2 = weight.shape
    assert D == D2, (features.shape, weight.shape)

    # F.normalize eps = 1e-12 -> 1/max(||x||, eps) == rsqrt(max(||x||^2, eps^2)).
    # Both norms are computed once, from the f32 operands (hoisted out of the grid).
    eps2 = jnp.float32(1e-24)
    inv_f = jax.lax.rsqrt(
        jnp.maximum(jnp.sum(features * features, axis=-1, keepdims=True), eps2))  # (B,1)
    inv_w = jax.lax.rsqrt(
        jnp.maximum(jnp.sum(weight * weight, axis=-1), eps2))[None, :]            # (1,C)
    lbl = labels.astype(jnp.int32).reshape(B, 1)

    f_mm = features.astype(compute_dtype)
    w_mm = weight.astype(compute_dtype)
    mm_itemsize = jnp.dtype(compute_dtype).itemsize

    # Class tiles: 128-lane multiples (or the full class dim); ragged boundary
    # blocks are handled by Pallas masking, so no weight/output padding needed.
    tile_c = C if tile_c >= C else max(128, (tile_c // 128) * 128)
    # Batch tiles: default to the whole batch so weights stream from HBM once,
    # clamped by a VMEM budget that stays under the scoped default on all gens.
    if tile_b is None:
        tile_b = _auto_tile_b(B, tile_c, D, mm_itemsize, vmem_budget_bytes)
    tile_b = B if tile_b >= B else max(8, (tile_b // 8) * 8)

    grid = (pl.cdiv(B, tile_b), pl.cdiv(C, tile_c))
    kernel = functools.partial(_li_arcface_kernel, m=float(m), s=float(s),
                               use_arcsin=_arcsin_supported())

    return pl.pallas_call(
        kernel,
        out_shape=jax.ShapeDtypeStruct((B, C), out_dtype),
        grid=grid,
        in_specs=[
            # labels / features / inv_f: resident across the (inner) class axis.
            pl.BlockSpec((tile_b, 1), lambda i, j: (i, 0)),
            pl.BlockSpec((tile_b, D), lambda i, j: (i, 0)),
            pl.BlockSpec((tile_b, 1), lambda i, j: (i, 0)),
            # weight + inv_w: streamed / double-buffered class tiles.
            pl.BlockSpec((tile_c, D), lambda i, j: (j, 0)),
            pl.BlockSpec((1, tile_c), lambda i, j: (0, j)),
        ],
        out_specs=pl.BlockSpec((tile_b, tile_c), lambda i, j: (i, j)),
        compiler_params=pltpu.CompilerParams(
            dimension_semantics=("parallel", "parallel")),
    )(lbl, f_mm, inv_f, w_mm, inv_w)


def li_arcface_ref(features, weight, labels, *, m, s):
    """Pure-JAX reference mirroring the PyTorch forward."""
    eps = 1e-12
    f_n = features / jnp.maximum(
        jnp.linalg.norm(features, axis=-1, keepdims=True), eps)
    w_n = weight / jnp.maximum(
        jnp.linalg.norm(weight, axis=-1, keepdims=True), eps)
    cos_theta = jnp.clip(f_n @ w_n.T, -1.0, 1.0)
    theta = jnp.arccos(cos_theta)
    one_hot = jax.nn.one_hot(labels, weight.shape[0], dtype=jnp.float32)
    output = one_hot * (theta + m) + (1.0 - one_hot) * theta
    return s * (math.pi - 2.0 * output) / math.pi


if __name__ == "__main__":
    # "config": embedding_dim=32, HEAD.m=0.45, HEAD.s=64.0 ; num_classes=200
    batch, embedding_dim, num_classes = 16, 32, 200
    m_margin, s_scale = 0.45, 64.0

    key = jax.random.PRNGKey(0)
    k_feat, k_w, k_lbl = jax.random.split(key, 3)

    features = jax.random.normal(k_feat, (batch, embedding_dim), dtype=jnp.float32)
    bound = math.sqrt(6.0 / (num_classes + embedding_dim))   # xavier_uniform_
    weight = jax.random.uniform(
        k_w, (num_classes, embedding_dim), dtype=jnp.float32,
        minval=-bound, maxval=bound)
    labels = jax.random.randint(k_lbl, (batch,), 0, num_classes, dtype=jnp.int32)

    ref = li_arcface_ref(features, weight, labels, m=m_margin, s=s_scale)

    # 1) Exact path: f32 MXU, small tiles -> 2x2 grid with ragged class boundary.
    out_f32 = li_arcface_head(features, weight, labels, m=m_margin, s=s_scale,
                              tile_b=8, tile_c=128, compute_dtype=jnp.float32)
    out_f32 = jax.block_until_ready(out_f32)
    if not jnp.allclose(out_f32, ref, atol=1e-3, rtol=1e-3):
        raise AssertionError(
            f"f32 path mismatch: max abs err {jnp.max(jnp.abs(out_f32 - ref))}")

    # 2) Default path: bf16 MXU operands, batch-resident tile, auto tile sizes.
    #    (logits are scaled by s=64 -> bf16 operand rounding gives ~1e-1 abs err)
    out_bf16 = li_arcface_head(features, weight, labels, m=m_margin, s=s_scale)
    out_bf16 = jax.block_until_ready(out_bf16)
    if not jnp.allclose(out_bf16, ref, atol=0.5):
        raise AssertionError(
            f"bf16 path mismatch: max abs err {jnp.max(jnp.abs(out_bf16 - ref))}")

    # 3) bf16 + small tiles: exercises streamed weight tiles + ragged masking.
    out_tiled = li_arcface_head(features, weight, labels, m=m_margin, s=s_scale,
                                tile_b=8, tile_c=128)
    out_tiled = jax.block_until_ready(out_tiled)
    if not jnp.allclose(out_tiled, ref, atol=0.5):
        raise AssertionError(
            f"tiled bf16 mismatch: max abs err {jnp.max(jnp.abs(out_tiled - ref))}")

    print("KERNEL_OK")
</pallas_src>

<mosaic_0001>
module attributes {stable_mosaic.version = 11 : i64} {
  func.func @_li_arcface_kernel(%arg0: i32, %arg1: i32, %arg2: memref<8x1xi32, #tpu.memory_space<vmem>>, %arg3: memref<8x32xf32, #tpu.memory_space<vmem>>, %arg4: memref<8x1xf32, #tpu.memory_space<vmem>>, %arg5: memref<128x32xf32, #tpu.memory_space<vmem>>, %arg6: memref<1x128xf32, #tpu.memory_space<vmem>>, %arg7: memref<8x128xf32, #tpu.memory_space<vmem>>) attributes {dimension_semantics = [#tpu.dimension_semantics<parallel>, #tpu.dimension_semantics<parallel>], iteration_bounds = array<i64: 2, 2>, scalar_prefetch = 0 : i64, scratch_operands = 0 : i64, tpu.core_type = #tpu.core_type<tc>, window_params = [{transform_indices = @transform_0, window_bounds = array<i64: 8, 1>}, {transform_indices = @transform_1, window_bounds = array<i64: 8, 32>}, {transform_indices = @transform_2, window_bounds = array<i64: 8, 1>}, {transform_indices = @transform_3, window_bounds = array<i64: 128, 32>}, {transform_indices = @transform_4, window_bounds = array<i64: 1, 128>}, {transform_indices = @transform_5, window_bounds = array<i64: 8, 128>}]} {
    %c0 = arith.constant 0 : index
    %c0_0 = arith.constant 0 : index
    %0 = vector.load %arg3[%c0, %c0_0] : memref<8x32xf32, #tpu.memory_space<vmem>>, vector<8x32xf32>
    %c0_1 = arith.constant 0 : index
    %c0_2 = arith.constant 0 : index
    %1 = vector.load %arg5[%c0_1, %c0_2] : memref<128x32xf32, #tpu.memory_space<vmem>>, vector<128x32xf32>
    %cst = arith.constant dense<0.000000e+00> : vector<8x128xf32>
    %2 = tpu.matmul %0, %1, %cst {dimension_numbers = #tpu.dot_dimension_numbers<[1], [1], [0], [0], [0, 0, 1, 0], [], []>} : vector<8x32xf32>, vector<128x32xf32>, vector<8x128xf32> -> vector<8x128xf32>
    %c0_3 = arith.constant 0 : index
    %c0_4 = arith.constant 0 : index
    %3 = vector.load %arg4[%c0_3, %c0_4] : memref<8x1xf32, #tpu.memory_space<vmem>>, vector<8x1xf32>
    %4 = vector.broadcast %3 : vector<8x1xf32> to vector<8x128xf32>
    %5 = arith.mulf %2, %4 : vector<8x128xf32>
    %c0_5 = arith.constant 0 : index
    %c0_6 = arith.constant 0 : index
    %6 = vector.load %arg6[%c0_5, %c0_6] : memref<1x128xf32, #tpu.memory_space<vmem>>, vector<1x128xf32>
    %7 = vector.broadcast %6 : vector<1x128xf32> to vector<8x128xf32>
    %8 = arith.mulf %5, %7 : vector<8x128xf32>
    %cst_7 = arith.constant -1.000000e+00 : f32
    %cst_8 = arith.constant 1.000000e+00 : f32
    %9 = vector.broadcast %cst_7 : f32 to vector<8x128xf32>
    %10 = arith.maximumf %9, %8 : vector<8x128xf32>
    %11 = vector.broadcast %cst_8 : f32 to vector<8x128xf32>
    %12 = arith.minimumf %11, %10 : vector<8x128xf32>
    %13 = arith.mulf %12, %12 : vector<8x128xf32>
    %cst_9 = arith.constant 1.000000e+00 : f32
    %14 = vector.broadcast %cst_9 : f32 to vector<8x128xf32>
    %15 = arith.subf %14, %13 : vector<8x128xf32>
    %cst_10 = arith.constant 0.000000e+00 : f32
    %16 = vector.broadcast %cst_10 : f32 to vector<8x128xf32>
    %17 = arith.maximumf %15, %16 : vector<8x128xf32>
    %18 = math.sqrt %17 : vector<8x128xf32>
    %19 = math.atan2 %12, %18 : vector<8x128xf32>
    %c0_11 = arith.constant 0 : index
    %c0_12 = arith.constant 0 : index
    %20 = vector.load %arg2[%c0_11, %c0_12] : memref<8x1xi32, #tpu.memory_space<vmem>>, vector<8x1xi32>
    %c128_i32 = arith.constant 128 : i32
    %21 = arith.muli %arg1, %c128_i32 : i32
    %22 = vector.broadcast %21 : i32 to vector<8x1xi32>
    %23 = arith.subi %20, %22 : vector<8x1xi32>
    %24 = tpu.iota {dimensions = array<i32: 1>} : vector<8x128xi32>
    %cst_13 = arith.constant 40.7436638 : f32
    %25 = vector.broadcast %cst_13 : f32 to vector<8x128xf32>
    %26 = arith.mulf %25, %19 : vector<8x128xf32>
    %27 = vector.broadcast %23 : vector<8x1xi32> to vector<8x128xi32>
    %28 = arith.cmpi eq, %24, %27 : vector<8x128xi32>
    %cst_14 = arith.constant 18.33465 : f32
    %29 = vector.broadcast %cst_14 : f32 to vector<8x128xf32>
    %30 = arith.subf %26, %29 : vector<8x128xf32>
    %31 = arith.select %28, %30, %26 : vector<8x128xi1>, vector<8x128xf32>
    %c0_15 = arith.constant 0 : index
    %c0_16 = arith.constant 0 : index
    %32 = vector.load %arg7[%c0_15, %c0_16] : memref<8x128xf32, #tpu.memory_space<vmem>>, vector<8x128xf32>
    tpu.vector_store %arg7[%c0_15, %c0_16], %31 {strides = array<i32>} : memref<8x128xf32, #tpu.memory_space<vmem>>, vector<8x128xf32>,
    return
  }
  func.func @transform_0(%arg0: i32, %arg1: i32) -> (i32, i32) {
    %c0_i32 = arith.constant 0 : i32
    %c0_i32_0 = arith.constant 0 : i32
    return %arg0, %c0_i32 : i32, i32
  }
  func.func @transform_1(%arg0: i32, %arg1: i32) -> (i32, i32) {
    %c0_i32 = arith.constant 0 : i32
    %c0_i32_0 = arith.constant 0 : i32
    return %arg0, %c0_i32 : i32, i32
  }
  func.func @transform_2(%arg0: i32, %arg1: i32) -> (i32, i32) {
    %c0_i32 = arith.constant 0 : i32
    %c0_i32_0 = arith.constant 0 : i32
    return %arg0, %c0_i32 : i32, i32
  }
  func.func @transform_3(%arg0: i32, %arg1: i32) -> (i32, i32) {
    %c0_i32 = arith.constant 0 : i32
    %c0_i32_0 = arith.constant 0 : i32
    return %arg1, %c0_i32 : i32, i32
  }
  func.func @transform_4(%arg0: i32, %arg1: i32) -> (i32, i32) {
    %c0_i32 = arith.constant 0 : i32
    %c0_i32_0 = arith.constant 0 : i32
    return %c0_i32, %arg1 : i32, i32
  }
  func.func @transform_5(%arg0: i32, %arg1: i32) -> (i32, i32) {
    %c0_i32 = arith.constant 0 : i32
    return %arg0, %arg1 : i32, i32
  }
}

</mosaic_0001>

<bundles_post_ra>
// kernel: tpu_custom_call.1
= control target key start
LH: loop header
LB: loop body
LE: loop exit
PB: predicated region body
PF: predicated region fallthrough
CT: control target
= control target key end

     0   :  { %10 = vsyncpa [#allocation3], 0  ;;  %s1236_s0 = inlined_call_operand.vmem [shape: s32[16,1], index: 0, kind: input, shape index: {}]   ;;  %s1237_s1 = inlined_call_operand.vmem [shape: f32[16,32], index: 1, kind: input, shape index: {}]   ;;  %s1238_s2 = inlined_call_operand.vmem [shape: f32[16,1], index: 2, kind: input, shape index: {}]   ;;  %s1239_s3 = inlined_call_operand.vmem [shape: f32[200,32], index: 3, kind: input, shape index: {}]   ;;  %s1240_s4 = inlined_call_operand.vmem [shape: f32[1,200], index: 4, kind: input, shape index: {}]   ;;  %s1241_s5 = inlined_call_operand.hbm [shape: f32[16,200], index: 5, kind: output, shape index: {}]  }
   0x1   :  { %12 = vsyncpa [#allocation3 + $0x1], 0  ;;  %s1018_s18 = smov 0   ;;  %s1020_s19 = smov 0  }
   0x2   :  { %s1022_s20 = smov 0   ;;  %s1024_s21 = smov 0  }
   0x3   :  { %s1026_s22 = smov 0   ;;  %s1028_s23 = smov 0  }
   0x4   :  { %s1030_s24 = smov 0   ;;  %s1032_s25 = smov 0  }
   0x5 LB: > { %s684_s26 = sadd.s32 4294967295, %s980_s25   ;;  %s685_s27 = sadd.s32 4294967294, %s980_s25   ;;  %s980_s25 = sphi %s1032_s25, %s18_s25   ;;  %s976_s24 = sphi %s1030_s24, %s1254_s24   ;;  %s972_s23 = sphi %s1028_s23, %s1253_s23   ;;  %s968_s22 = sphi %s1026_s22, %s1252_s22   ;;  %s964_s21 = sphi %s1024_s21, %s1251_s21   ;;  %s960_s20 = sphi %s1022_s20, %s1250_s20   ;;  %s956_s19 = sphi %s1020_s19, %s1249_s19   ;;  %s952_s18 = sphi %s1018_s18, %s1248_s18  }
   0x6   : > { %s27_s28 = sadd.s32 1, %s972_s23  ;;  %s30_s29 = sadd.s32 1, %s976_s24 }
   0x7   : > { %p28_p0 = scmp.ge.s32.totalorder %s27_s28, 2  ;;  %p179_p1 = scmp.ne.s32.totalorder %s960_s20, %s956_s19 }
   0x8   : > { %p180_p2 = scmp.eq.s32.totalorder %s684_s26, 3  ;;  %p185_p5 = scmp.ne.s32.totalorder %s956_s19, %s952_s18 }
   0x9   : > { %s1256_s28 = smov (%p28_p0, %s27_s28), 0  ;;  %s1258_s29 = smov (!%p28_p0, %s30_s29), %s976_s24 }
   0xa   : > { %s165_s30 = ssub.s32 %s972_s23, %s1256_s28  ;;  %p1069_p3 = por %p180_p2, %p179_p1 }
   0xb   : > { %p32_p4 = scmp.ge.s32.totalorder %s1258_s29, 2  ;;  %p186_p6 = scmp.eq.s32.totalorder %s685_s27, 3 }
   0xc   : > { %p688_p7 = scmp.ge.s32.totalorder %s980_s25, 1  ;;  %p248_p9 = scmp.lt.s32.totalorder %s980_s25, 5 }
   0xd   : > { %s1260_s29 = smov (%p32_p4, %s1258_s29), 0  ;;  %p1078_p8 = por %p186_p6, %p185_p5 }
   0xe   : > { %s164_s8 = ssub.s32 %s976_s24, %s1260_s29  ;;  %s169_s9 = sadd.s32 1, %s960_s20 }
   0xf   : > { %s166_s10 = sor.u32 %s165_s30, %s164_s8  ;;  %p249_p10 = pnand %p688_p7, %p248_p9 }
  0x10   : > { %p167_p11 = scmp.eq.s32.totalorder %s166_s10, 0  ;;  %s693_s12 = sshll.u32 (!%p249_p10), %s964_s21, 4  ;;  %v982_v0 = vmov (!%p249_p10), 0.0|0.0   ;;  %vm983_vm0 = vmmov (!%p249_p10), 0   ;;  %v984_v1 = vmov (!%p249_p10), 0.0   ;;  %v985_v2 = vmov (!%p249_p10), 0  }
  0x11   : > { %252 = sbr.rel (%p249_p10) target bundleno = 418 (0x1a2), region = 40  ;;  %p295_p12 = scmp.lt.s32.totalorder (!%p249_p10), %s968_s22, 1  ;;  %773 = vmatprep.subr.bf16.mxu0 (!%p249_p10), %v982_v0  ;;  %770 = vmatprep.mubr.msk.f32.mxu0 (!%p249_p10), %vm983_vm0, %v984_v1  ;;  %vm341_vm1 = vcmask (!%p249_p10), 261120  }
  0x12   : > { %s1087_s11 = scalar_select %p167_p11, %s960_s20, %s169_s9  }
  0x13   : > { %p312_p13 = scmp.lt.s32.totalorder (!%p249_p10), %s693_s12, 24  ;;  %881 = vset.pattern.permute.xlu0 (!%p249_p10), %v985_v2  ;;  %vm1102_vm2 = vmpackc.low (!%p249_p10), %vm341_vm1, %vm341_vm1  ;;  %s714_s26 = sshll.u32 (!%p249_p10), %s964_s21, 7 }
  0x14   : > { %v539_v7 = vstv (!%p249_p10), %s714_s26  ;;  %p321_p0 = scmp.lt.s32.totalorder (!%p249_p10), %s964_s21, 1  ;;  %s717_s10 = sshll.u32 (!%p249_p10), %s968_s22, 1 }
  0x15   : > { %s987_s8 = smov (!%p249_p10), [#allocation2]  }
  0x18   : > { %s1262_s12 = smov (!%p312_p13, %s693_s12), 24 }
  0x19   : > { %s296_s13 = scalar_select %p295_p12, %s968_s22, 1 }
  0x1a   : > { %s694_s14 = sshll.u32 %s1262_s12, 3  ;;  %s563_s12 = sadd.s32 %s964_s21, %s717_s10 }
  0x1b   : > { %s1096_s17 = scalar_lea.vmem %s1239_s3, %s694_s14  ;;  %s1107_s27 = sshll.u32 %s296_s13, 3 }
  0x1c   : > { %v325_v3 = vld [vmem:[%s1096_s17] sm:$0xff]  ;;  %v326_v4 = vld [vmem:[%s1096_s17 + $0x8] sm:$0xff]  ;;  %s306_s9 = scalar_lea.vmem %s1238_s2, %s1107_s27  ;;  %s298_s14 = scalar_lea.vmem %s1236_s0, %s1107_s27  ;;  %v327_v8 = vld [vmem:[%s1096_s17 + $0x10] sm:$0xff] }
  0x1d   : > { %v774_v6 = vpack.c.bf16 %v326_v4, %v325_v3  ;;  %v328_v9 = vld [vmem:[%s1096_s17 + $0x18] sm:$0xff]  ;;  %v463_v10 = vld [vmem:[%s306_s9] sm:$0xff]  ;;  %v330_v15 = vld [vmem:[%s1096_s17 + $0x28] sm:$0xff]  ;;  %s302_s16 = scalar_lea.vmem %s1237_s1, %s1107_s27 }
  0x1e   : > { %v537_v11 = vld [vmem:[%s298_s14] sm:$0xff]  ;;  %466 = vperm.xlu0 %881, %v463_v10   ;;  %v778_v13 = vpack.c.bf16 %v328_v9, %v327_v8  ;;  %v331_v17 = vld [vmem:[%s1096_s17 + $0x30] sm:$0xff]  ;;  %v332_v18 = vld [vmem:[%s1096_s17 + $0x38] sm:$0xff]  ;;  %s322_s26 = scalar_select %p321_p0, %s964_s21, 1 }
  0x1f   : > { %776 = vmatpush3.bf16.xpose.msk.msra.mxu0 %vm1102_vm2, %v774_v6  ;;  %v540_v12 = vsub.s32 %v537_v11, %v539_v7  ;;  %v329_v14 = vld [vmem:[%s1096_s17 + $0x20] sm:$0xff]  ;;  %v786_v19 = vpack.c.bf16 %v332_v18, %v331_v17  ;;  %v334_v21 = vld [vmem:[%s1096_s17 + $0x48] sm:$0xff]  ;;  %v335_v23 = vld [vmem:[%s1096_s17 + $0x50] sm:$0xff]  ;;  %v986_v17 = vmov 0.7853982   ;;  %s718_s14 = sshll.u32 %s563_s12, 7 }
  0x20   : > { %777 = vmatprep.subr.bf16.mxu0 %v982_v0  ;;  %v782_v16 = vpack.c.bf16 %v330_v15, %v329_v14  ;;  %v333_v20 = vld [vmem:[%s1096_s17 + $0x40] sm:$0xff]  ;;  %v336_v24 = vld [vmem:[%s1096_s17 + $0x58] sm:$0xff]  ;;  %v338_v27 = vld [vmem:[%s1096_s17 + $0x68] sm:$0xff]  ;;  %s323_s9 = scalar_lea.vmem %s1240_s4, %s322_s26  ;;  %s1181_s22 = scalar_lea.hbm %s1241_s5, %s718_s14 }
  0x21   : > { %v790_v22 = vpack.c.bf16 %v334_v21, %v333_v20  ;;  %v794_v25 = vpack.c.bf16 %v336_v24, %v335_v23  ;;  %v337_v26 = vld [vmem:[%s1096_s17 + $0x60] sm:$0xff]  ;;  %v339_v29 = vld [vmem:[%s1096_s17 + $0x70] sm:$0xff]  ;;  %v340_v30 = vld [vmem:[%s1096_s17 + $0x78] sm:$0xff]  ;;  %s292_s17 = sand.u32 1, %s956_s19   ;;  %v541_v20 = vlaneseq }
  0x22   : > { %545 = vperm.xlu0 %881, %v540_v12   ;;  %v798_v28 = vpack.c.bf16 %v338_v27, %v337_v26  ;;  %v802_v31 = vpack.c.bf16 %v340_v30, %v339_v29  ;;  %v324_v32 = vld [vmem:[%s302_s16] sm:$0xff]  ;;  %s689_s27 = sshll.u32 %s292_s17, 3  ;;  %s552_s21 = scalar_lea.sflag [#allocation3], %s292_s17 }
  0x23   : > { %v712_v35 = vld [vmem:[%s323_s9] ss:$0 sm:$0xff]  ;;  %v542_v23 = vand.u32 127, %v541_v20  ;;  %s294_s13 = scalar_lea.vmem [#allocation2], %s689_s27  ;;  %s890_s9 = sshll.u32 %s987_s8, 4  ;;  %s891_s9 = int_to_ptr.vmem [resolvable:$false] %s890_s9 }
  0x24   : > { %s567_s15 = sshll.u32 %s294_s13, 4  ;;  %s892_s27 = scalar_lea.vmem %s891_s9, 256  ;;  %s1183_s15 = int_to_ptr.vmem [resolvable:$true] %s567_s15 }
  0x25   : > { %s886_s30 = scalar_lea.vmem %s1183_s15, 128  ;;  %p893_p5 = scmp.lt.s32.totalorder %s1183_s15, %s891_s9 }
  0x26   : > { %p887_p1 = scmp.ne.s32.totalorder %s1183_s15, %s886_s30  ;;  %p894_p6 = scmp.lt.s32.totalorder %s892_s27, %s886_s30 }
  0x27   : > { %780 = vmatpush3.bf16.xpose.msk.msra.mxu0 %vm1102_vm2, %v778_v13 }
  0x28   : > { %781 = vmatprep.subr.bf16.mxu0 %v982_v0  ;;  %p888_p2 = pnand %p887_p1, %p1069_p3  ;;  %p895_p7 = por %p894_p6, %p893_p5 }
  0x2a   : > { %p889_p4 = pneg %p888_p2 }
  0x2c   : > { %p896_p9 = pnand %p895_p7, %p889_p4 }
  0x2f   : > { %784 = vmatpush3.bf16.xpose.msk.msra.mxu0 %vm1102_vm2, %v782_v16 }
  0x30   : > { %785 = vmatprep.subr.bf16.mxu0 %v982_v0 }
  0x37   : > { %788 = vmatpush3.bf16.xpose.msk.msra.mxu0 %vm1102_vm2, %v786_v19 }
  0x38   : > { %789 = vmatprep.subr.bf16.mxu0 %v982_v0 }
  0x3f   : > { %792 = vmatpush3.bf16.xpose.msk.msra.mxu0 %vm1102_vm2, %v790_v22 }
  0x40   : > { %793 = vmatprep.subr.bf16.mxu0 %v982_v0 }
  0x47   : > { %796 = vmatpush3.bf16.xpose.msk.msra.mxu0 %vm1102_vm2, %v794_v25 }
  0x48   : > { %797 = vmatprep.subr.bf16.mxu0 %v982_v0 }
  0x4f   : > { %800 = vmatpush3.bf16.xpose.msk.msra.mxu0 %vm1102_vm2, %v798_v28 }
  0x50   : > { %801 = vmatprep.subr.bf16.mxu0 %v982_v0 }
  0x57   : > { %804 = vmatpush3.bf16.xpose.msk.msra.mxu0 %vm1102_vm2, %v802_v31 }
  0x5e   : > { %771 = vmatmul.mubr.msk.f32.vlgmr.msra.gmra.mrb[0].mxu0 %vm341_vm1, %v324_v32 }
  0x9d   : > { %v467_v33 = vpop.permute.xlu0 %466 }
  0xa1   : > { %v546_v25 = vpop.permute.xlu0 %545 }
  0xa2   : > { %vm547_vm15 = vcmp.eq.s32.totalorder %v542_v23, %v546_v25 }
 0x131   : > { %v459_v34 = vpop.f32.mrb[0].mxu0 }
 0x132   : > { %v469_v36 = vmul.f32 %v467_v33, %v459_v34  ;;  %v772_v37 = vpop.f32.mrb[1].mxu0 }
 0x134   : > { %v477_v38 = vmul.f32 %v712_v35, %v469_v36 }
 0x136   : > { %v1157_v39 = vclamps-f32 %v477_v38, 1.0 }
 0x138   : > { %v480_v40 = vmul.f32 %v1157_v39, %v1157_v39  ;;  %v491_v48 = vand.u32 2147483647, %v1157_v39  ;;  %vm525_vm6 = vcmp.ne.f32.partialorder %v1157_v39, %v1157_v39  ;;  %vm522_vm12 = vcmp.eq.f32.partialorder %v1157_v39, 0.0 }
 0x139   : > { %v535_v22 = vand.u32 2147483648, %v1157_v39 }
 0x13a   : > { %v481_v41 = vsub.f32 1.0, %v480_v40  ;;  %vm531_vm13 = vcmp.eq.s32.totalorder %v491_v48, inf }
 0x13c   : > { %v482_v42 = vmax.f32 %v481_v41, 0.0 }
 0x13e   : > { %882 = vrsqrt.f32 %v482_v42  ;;  %vm485_vm3 = vcmp.eq.f32.partialorder %v482_v42, inf  ;;  %v488_v45 = vand.u32 2147483648, %v482_v42  ;;  %vm487_vm4 = vcmp.eq.f32.partialorder %v482_v42, 0.0 }
 0x148   : > { %v883_v43 = vpop.eup %882 }
 0x149   : > { %v484_v44 = vmul.f32 %v883_v43, %v482_v42 }
 0x14b   : > { %v486_v46 = vsel %vm485_vm3, %v482_v42, %v484_v44 }
 0x14c   : > { %v489_v47 = vsel %vm487_vm4, %v488_v45, %v486_v46 }
 0x14d   : > { %v490_v49 = vand.u32 2147483647, %v489_v47  ;;  %vm524_vm5 = vcmp.ne.f32.partialorder %v489_v47, %v489_v47  ;;  %vm520_vm9 = vcmp.lt.s32.totalorder %v489_v47, 0  ;;  %vm517_vm10 = vcmp.lt.f32.partialorder %v489_v47, 0.0 }
 0x14e   : > { %vm1164_vm7 = vmor %vm524_vm5, %vm525_vm6  ;;  %v521_v14 = vsel %vm520_vm9, 3.1415927, %v984_v1  ;;  %v529_v18 = vsel %vm517_vm10, 2.3561945, %v986_v17 }
 0x14f   : > { %v493_v51 = vmax.f32 %v490_v49, %v491_v48  ;;  %v492_v52 = vmin.f32 %v490_v49, %v491_v48  ;;  %vm514_vm8 = vcmp.gt.f32.partialorder %v491_v48, %v490_v49  ;;  %vm530_vm11 = vcmp.eq.s32.totalorder %v490_v49, inf }
 0x150   : > { %vm532_vm14 = vmand %vm530_vm11, %vm531_vm13 }
 0x151   : > { %884 = vrcp.f32 %v493_v51 }
 0x15b   : > { %v885_v53 = vpop.eup %884 }
 0x15c   : > { %v495_v54 = vmul.f32 %v885_v53, %v492_v52 }
 0x15e   : > { %v496_v55 = vmul.f32 %v495_v54, %v495_v54 }
 0x160   : > { %v497_v56 = vmul.f32 0.002785687, %v496_v55 }
 0x162   : > { %v498_v57 = vadd.f32 -0.015866, %v497_v56 }
 0x164   : > { %v499_v58 = vmul.f32 %v498_v57, %v496_v55 }
 0x166   : > { %v500_v59 = vadd.f32 0.04247222, %v499_v58 }
 0x168   : > { %v501_v60 = vmul.f32 %v500_v59, %v496_v55 }
 0x16a   : > { %v502_v61 = vadd.f32 -0.074975304, %v501_v60 }
 0x16c   : > { %v503_v62 = vmul.f32 %v502_v61, %v496_v55 }
 0x16e   : > { %v504_v63 = vadd.f32 0.1064488, %v503_v62 }
 0x170   : > { %v505_v0 = vmul.f32 %v504_v63, %v496_v55 }
 0x172   : > { %v506_v2 = vadd.f32 -0.14207031, %v505_v0 }
 0x174   : > { %v507_v3 = vmul.f32 %v506_v2, %v496_v55 }
 0x176   : > { %v508_v4 = vadd.f32 0.19993454, %v507_v3 }
 0x178   : > { %v509_v5 = vmul.f32 %v508_v4, %v496_v55 }
 0x17a   : > { %v510_v6 = vadd.f32 -0.33333147, %v509_v5 }
 0x17c   : > { %v511_v7 = vmul.f32 %v510_v6, %v496_v55 }
 0x17e   : > { %v512_v8 = vmul.f32 %v511_v7, %v495_v54 }
 0x180   : > { %v513_v9 = vadd.f32 %v512_v8, %v495_v54 }
 0x182   : > { %v515_v10 = vsub.f32 1.5707964, %v513_v9 }
 0x184   : > { %v516_v11 = vsel %vm514_vm8, %v515_v10, %v513_v9 }
 0x185   : > { %v518_v12 = vsub.f32 3.1415927, %v516_v11 }
 0x187   : > { %v519_v13 = vsel %vm517_vm10, %v518_v12, %v516_v11 }
 0x188   : > { %v523_v15 = vsel %vm522_vm12, %v521_v14, %v519_v13 }
 0x189   : > { %v527_v16 = vsel %vm1164_vm7, nan, %v523_v15 }
 0x18a   : > { %v533_v19 = vsel %vm532_vm14, %v529_v18, %v527_v16 }
 0x18b   : > { %v534_v21 = vand.u32 2147483647, %v533_v19 }
 0x18d   : > { %v536_v1 = vor.u32 %v535_v22, %v534_v21 }
 0x18f   : > { %v543_v24 = vmul.f32 40.743664, %v536_v1 }
 0x191   : > { %v715_v26 = vadd.f32 -18.33465, %v543_v24 }
 0x193   : > { %v549_v27 = vsel %vm547_vm15, %v715_v26, %v543_v24 }
 0x194   : > { %550 = vst [vmem:[%s294_s13] sm:$0xff] %v549_v27 }
 0x195   : > { %899 = shalt.err (!%p896_p9)
}
 0x196   : > { %s900_s17 = scalar_lea.hbm %s1181_s22, 128  ;;  %s904_s14 = scalar_lea.hbm %s1241_s5, 512 }
 0x197   : > { %p901_p10 = scmp.ne.s32.totalorder %s1181_s22, %s900_s17  ;;  %p905_p13 = scmp.lt.u32.totalorder %s1181_s22, %s1241_s5 }
 0x198   : > { %p906_p0 = scmp.lt.u32.totalorder %s904_s14, %s900_s17  ;;  %p908_p2 = scmp.lt.u32.totalorder %s900_s17, %s1181_s22 }
 0x199   : > { %p902_p11 = pnand %p901_p10, %p1069_p3 }
 0x19a   : > { %p907_p1 = por %p906_p0, %p905_p13 }
 0x19b   : > { %p903_p12 = pneg %p902_p11 }
 0x19c   : > { %p909_p4 = por %p908_p2, %p907_p1 }
 0x19e   : > { %p910_p5 = pnand %p909_p4, %p903_p12 }
 0x1a0   : > { %913 = shalt.err (!%p910_p5)
}
 0x1a1   : > { %805 = dma.vmem_to_hbm [thread:$0]  (%p1069_p3), %s1183_s15, 128, %s1181_s22, %s552_s21  }
 0x1a2 PF: > { %p811_p6 = scmp.ge.s32.totalorder %s980_s25, 2  ;;  %s579_s26 = sand.u32 1, %s952_s18  }
 0x1a3   : > { %s580_s30 = scalar_lea.sflag [#allocation3], %s579_s26 }
 0x1a4   : > { %p808_p7 = pnand %p811_p6, %p1078_p8 }
 0x1a6   : > { %947 = dma.done.wait (!%p808_p7), %s580_s30, 128  }
 0x1a7   : > { %949 = vsyncadd (!%p808_p7), %s580_s30, 4294967168  ;;  %s18_s25 = sadd.s32 1, %s980_s25   ;;  %s1248_s18 = smov %s956_s19 }
 0x1a8   : > { %p15_p9 = scmp.ge.s32.totalorder %s18_s25, 6   ;;  %s1249_s19 = smov %s960_s20 }
 0x1a9   : > { %s1250_s20 = smov %s1087_s11  ;;  %s1251_s21 = smov %s972_s23 }
 0x1aa   : > { %s1252_s22 = smov %s976_s24  ;;  %s1253_s23 = smov %s1256_s28 }
 0x1ab   : > { %s1254_s24 = smov %s1260_s29  ;;  %17 = sbr.rel (!%p15_p9) target bundleno = 5 (0x5), region = 87 }
 0x1b2   :  { %585 = vsyncpa [#allocation3], 1 }
 0x1b3   :  { %587 = vsyncpa [#allocation3 + $0x1], 1 }

</bundles_post_ra>
